<compile_context>
chip_gen: v7x
topology: tpu7x:2x2x1
jax: 0.10.0
libtpu: 0.0.40
codegen_flags: <defaults>
</compile_context>

<pallas_src>
import math
import functools
from dataclasses import dataclass

import jax
import jax.numpy as jnp
from jax.experimental import pallas as pl
from jax.experimental.pallas import tpu as pltpu


@dataclass(frozen=True)
class GPTNeoConfig:
    n_embd: int = 32
    n_head: int = 4
    local_heads: int = 2
    window_size: int = 4
    attention_dropout: float = 0.0
    resid_dropout: float = 0.0


# ----------------------------- Pallas kernel --------------------------------

def _self_attention_kernel(h_ref, wqkv_ref, wo_ref, bo_ref, o_ref, *,
                           global_heads, window_size, scale):
    """One batch element: head-batched QKV proj + masked softmax + out_proj."""
    S = h_ref.shape[0]                      # query/key length
    H, _, three_d = wqkv_ref.shape
    D = three_d // 3

    # Activations in their native dtype -- no upcast; matmuls accumulate in f32.
    x = h_ref[...]                                              # (S, Ep)
    xh = jnp.broadcast_to(x, (H,) + x.shape)                    # (H, S, Ep)

    # Fused, head-batched QKV projection (weights are head-major, resident).
    qkv = jnp.einsum('hse,hed->hsd', xh, wqkv_ref[...],
                     preferred_element_type=jnp.float32)        # (H, S, 3D)
    q = qkv[..., 0 * D:1 * D] * scale                           # (H, S, D)
    k = qkv[..., 1 * D:2 * D]
    v = qkv[..., 2 * D:3 * D]

    # Additive mask bias built in-kernel (no HBM mask DMA): 0 where attended,
    # -1e30 where masked.  Heads >= global_heads additionally get the local
    # window [i - window_size, i].
    row = jax.lax.broadcasted_iota(jnp.int32, (H, S, S), 1)
    col = jax.lax.broadcasted_iota(jnp.int32, (H, S, S), 2)
    hid = jax.lax.broadcasted_iota(jnp.int32, (H, S, S), 0)
    masked = (col > row) | ((hid >= global_heads) & (col < row - window_size))
    bias = jnp.where(masked, jnp.float32(-1e30), jnp.float32(0.0))

    # Scores / softmax (f32 math).
    s = jnp.einsum('hqd,hkd->hqk', q, k,
                   preferred_element_type=jnp.float32) + bias   # (H, S, S)
    m = jnp.max(s, axis=-1, keepdims=True)
    p = jnp.exp(s - m)
    p = p * pl.reciprocal(jnp.sum(p, axis=-1, keepdims=True), approx=True)
    # TODO(synk): attn_dropout is identity (p = 0, inference mode).

    ctx = jnp.einsum('hqk,hkd->hqd', p, v,
                     preferred_element_type=jnp.float32)        # (H, S, D)

    # out_proj: one head-batched MXU matmul against head-major W_out, then a
    # single leading-axis reduction ( == concat_h(ctx_h) @ W_out ), plus bias.
    outh = jnp.einsum('hqd,hde->hqe', ctx, wo_ref[...],
                      preferred_element_type=jnp.float32)       # (H, S, Ep)
    out = jnp.sum(outh, axis=0) + bo_ref[...]                   # (S, Ep)
    # TODO(synk): resid_dropout is identity (p = 0, inference mode).
    o_ref[...] = out.astype(o_ref.dtype)


def gpt_neo_self_attention(hidden_states, w_q, w_k, w_v, w_out, b_out, config):
    """hidden_states: [B,S,E]; w_q/w_k/w_v/w_out: [E,E]; b_out: [E]."""
    B, S, E = hidden_states.shape
    H = config.n_head
    D = E // H
    LANE = 128
    Ep = ((E + LANE - 1) // LANE) * LANE    # lane-dense padded embedding dim

    # -------- one-time parameter layout plumbing (cached at init in practice) --
    def head_major(w):                       # (E, E) -> (H, E, D): w[:, hD:(h+1)D]
        return w.reshape(E, H, D).transpose(1, 0, 2)

    wqkv_r = jnp.concatenate(
        [head_major(w_q), head_major(w_k), head_major(w_v)], axis=-1)   # (H, E, 3D)
    wqkv_r = jnp.pad(wqkv_r, ((0, 0), (0, Ep - E), (0, 0)))             # (H, Ep, 3D)
    wo_r = jnp.pad(w_out, ((0, 0), (0, Ep - E))).reshape(H, D, Ep)      # (H, D, Ep)
    bo_p = jnp.pad(b_out, (0, Ep - E)).reshape(1, Ep)                   # (1, Ep)
    h_p = jnp.pad(hidden_states, ((0, 0), (0, 0), (0, Ep - E)))         # (B, S, Ep)

    kernel = functools.partial(
        _self_attention_kernel,
        global_heads=H - config.local_heads,
        window_size=config.window_size,
        scale=1.0 / math.sqrt(D),
    )

    out_p = pl.pallas_call(
        kernel,
        grid=(B,),
        in_specs=[
            pl.BlockSpec((None, S, Ep), lambda b: (b, 0, 0)),      # per-batch activations
            pl.BlockSpec((H, Ep, 3 * D), lambda b: (0, 0, 0)),     # resident fused QKV weight
            pl.BlockSpec((H, D, Ep), lambda b: (0, 0, 0)),         # resident out_proj weight
            pl.BlockSpec((1, Ep), lambda b: (0, 0)),               # resident out_proj bias
        ],
        out_specs=pl.BlockSpec((None, S, Ep), lambda b: (b, 0, 0)),
        out_shape=jax.ShapeDtypeStruct((B, S, Ep), hidden_states.dtype),
        compiler_params=pltpu.CompilerParams(
            dimension_semantics=("parallel",),
            vmem_limit_bytes=32 * 1024 * 1024,
        ),
    )(h_p, wqkv_r, wo_r, bo_p)
    return out_p[..., :E]


# ------------------------ pure-JAX reference (for checking) ------------------

def self_attention_ref(hidden_states, w_q, w_k, w_v, w_out, b_out, config):
    B, S, E = hidden_states.shape
    H = config.n_head
    D = E // H
    Gh = H - config.local_heads
    scale = 1.0 / math.sqrt(D)

    def heads(t):
        return t.reshape(B, S, H, D).transpose(0, 2, 1, 3)          # (B, H, S, D)

    q = heads(hidden_states @ w_q) * scale
    k = heads(hidden_states @ w_k)
    v = heads(hidden_states @ w_v)
    s = jnp.einsum('bhqd,bhkd->bhqk', q, k)

    i = jnp.arange(S)[:, None]
    j = jnp.arange(S)[None, :]
    causal_bad = j > i
    local_bad = causal_bad | (j < i - config.window_size)
    bad = jnp.concatenate(
        [jnp.broadcast_to(causal_bad, (Gh, S, S)),
         jnp.broadcast_to(local_bad, (config.local_heads, S, S))], axis=0)
    s = jnp.where(bad[None], -jnp.inf, s)

    p = jax.nn.softmax(s, axis=-1)
    ctx = jnp.einsum('bhqk,bhkd->bhqd', p, v)
    ctx = ctx.transpose(0, 2, 1, 3).reshape(B, S, E)
    return ctx @ w_out + b_out


# ----------------------------------- main ------------------------------------

if __name__ == "__main__":
    config = GPTNeoConfig(n_embd=32, n_head=4, local_heads=2, window_size=4)
    B, S, E = 2, 8, config.n_embd

    key = jax.random.PRNGKey(0)
    kx, kq, kk, kv, ko, kb = jax.random.split(key, 6)
    w_scale = 1.0 / math.sqrt(E)
    hidden = jax.random.normal(kx, (B, S, E), jnp.float32)
    w_q = w_scale * jax.random.normal(kq, (E, E), jnp.float32)
    w_k = w_scale * jax.random.normal(kk, (E, E), jnp.float32)
    w_v = w_scale * jax.random.normal(kv, (E, E), jnp.float32)
    w_o = w_scale * jax.random.normal(ko, (E, E), jnp.float32)
    b_o = 0.02 * jax.random.normal(kb, (E,), jnp.float32)

    out = gpt_neo_self_attention(hidden, w_q, w_k, w_v, w_o, b_o, config)
    out = jax.block_until_ready(out)

    assert out.shape == (B, S, E)
    assert bool(jnp.all(jnp.isfinite(out)))

    ref = self_attention_ref(hidden, w_q, w_k, w_v, w_o, b_o, config)
    max_err = float(jnp.max(jnp.abs(out - ref)))
    assert jnp.allclose(out, ref, rtol=2e-2, atol=2e-3), max_err

    print("KERNEL_OK")
</pallas_src>

<mosaic_0001>
module attributes {stable_mosaic.version = 11 : i64} {
  func.func @_self_attention_kernel(%arg0: i32, %arg1: memref<1x8x128xf32, #tpu.memory_space<vmem>>, %arg2: memref<4x128x24xf32, #tpu.memory_space<vmem>>, %arg3: memref<4x8x128xf32, #tpu.memory_space<vmem>>, %arg4: memref<1x128xf32, #tpu.memory_space<vmem>>, %arg5: memref<1x8x128xf32, #tpu.memory_space<vmem>>) attributes {dimension_semantics = [#tpu.dimension_semantics<parallel>], iteration_bounds = array<i64: 2>, scalar_prefetch = 0 : i64, scratch_operands = 0 : i64, tpu.core_type = #tpu.core_type<tc>, window_params = [{transform_indices = @transform_0, window_bounds = array<i64: 1, 8, 128>}, {pipeline_mode = #tpu.pipeline_mode<synchronous>, transform_indices = @transform_1, window_bounds = array<i64: 4, 128, 24>}, {pipeline_mode = #tpu.pipeline_mode<synchronous>, transform_indices = @transform_2, window_bounds = array<i64: 4, 8, 128>}, {pipeline_mode = #tpu.pipeline_mode<synchronous>, transform_indices = @transform_3, window_bounds = array<i64: 1, 128>}, {transform_indices = @transform_4, window_bounds = array<i64: 1, 8, 128>}]} {
    %c0 = arith.constant 0 : index
    %c0_0 = arith.constant 0 : index
    %c0_1 = arith.constant 0 : index
    %0 = vector.load %arg1[%c0, %c0_0, %c0_1] : memref<1x8x128xf32, #tpu.memory_space<vmem>>, vector<1x8x128xf32>
    %1 = vector.shape_cast %0 : vector<1x8x128xf32> to vector<8x128xf32>
    %2 = vector.shape_cast %1 : vector<8x128xf32> to vector<1x8x128xf32>
    %3 = vector.broadcast %2 : vector<1x8x128xf32> to vector<4x8x128xf32>
    %c0_2 = arith.constant 0 : index
    %c0_3 = arith.constant 0 : index
    %c0_4 = arith.constant 0 : index
    %4 = vector.load %arg2[%c0_2, %c0_3, %c0_4] : memref<4x128x24xf32, #tpu.memory_space<vmem>>, vector<4x128x24xf32>
    "tpu.trace_start"() <{level = 10 : i32, message = "hse,hed->hsd"}> : () -> ()
    %cst = arith.constant dense<0.000000e+00> : vector<4x8x24xf32>
    %5 = tpu.matmul %3, %4, %cst {dimension_numbers = #tpu.dot_dimension_numbers<[2], [1], [1], [2], [0, 0, 0, 1, 1, 2], [0], [0]>} : vector<4x8x128xf32>, vector<4x128x24xf32>, vector<4x8x24xf32> -> vector<4x8x24xf32>
    "tpu.trace_stop"() : () -> ()
    %6 = vector.extract_strided_slice %5 {offsets = [0, 0, 0], sizes = [4, 8, 8], strides = [1, 1, 1]} : vector<4x8x24xf32> to vector<4x8x8xf32>
    %cst_5 = arith.constant 0.353553385 : f32
    %7 = vector.broadcast %cst_5 : f32 to vector<4x8x8xf32>
    %8 = arith.mulf %6, %7 : vector<4x8x8xf32>
    %9 = vector.extract_strided_slice %5 {offsets = [0, 0, 8], sizes = [4, 8, 8], strides = [1, 1, 1]} : vector<4x8x24xf32> to vector<4x8x8xf32>
    %10 = vector.extract_strided_slice %5 {offsets = [0, 0, 16], sizes = [4, 8, 8], strides = [1, 1, 1]} : vector<4x8x24xf32> to vector<4x8x8xf32>
    %11 = tpu.iota {dimensions = array<i32: 1>} : vector<4x8x8xi32>
    %12 = tpu.iota {dimensions = array<i32: 2>} : vector<4x8x8xi32>
    %13 = tpu.iota {dimensions = array<i32: 0>} : vector<4x8x8xi32>
    %14 = arith.cmpi sgt, %12, %11 : vector<4x8x8xi32>
    %c2_i32 = arith.constant 2 : i32
    %15 = vector.broadcast %c2_i32 : i32 to vector<4x8x8xi32>
    %16 = arith.cmpi sge, %13, %15 : vector<4x8x8xi32>
    %c4_i32 = arith.constant 4 : i32
    %17 = vector.broadcast %c4_i32 : i32 to vector<4x8x8xi32>
    %18 = arith.subi %11, %17 : vector<4x8x8xi32>
    %19 = arith.cmpi slt, %12, %18 : vector<4x8x8xi32>
    %20 = arith.andi %16, %19 : vector<4x8x8xi1>
    %21 = arith.ori %14, %20 : vector<4x8x8xi1>
    %cst_6 = arith.constant -1.000000e+30 : f32
    %cst_7 = arith.constant 0.000000e+00 : f32
    %22 = vector.broadcast %cst_6 : f32 to vector<4x8x8xf32>
    %23 = vector.broadcast %cst_7 : f32 to vector<4x8x8xf32>
    %24 = arith.select %21, %22, %23 : vector<4x8x8xi1>, vector<4x8x8xf32>
    "tpu.trace_start"() <{level = 10 : i32, message = "hqd,hkd->hqk"}> : () -> ()
    %cst_8 = arith.constant dense<0.000000e+00> : vector<4x8x8xf32>
    %25 = tpu.matmul %8, %9, %cst_8 {dimension_numbers = #tpu.dot_dimension_numbers<[2], [2], [1], [1], [0, 0, 0, 1, 1, 1], [0], [0]>} : vector<4x8x8xf32>, vector<4x8x8xf32>, vector<4x8x8xf32> -> vector<4x8x8xf32>
    "tpu.trace_stop"() : () -> ()
    %26 = arith.addf %25, %24 : vector<4x8x8xf32>
    %cst_9 = arith.constant dense<0xFF800000> : vector<4x8xf32>
    %27 = vector.multi_reduction <maximumf>, %26, %cst_9 [2] : vector<4x8x8xf32> to vector<4x8xf32>
    %28 = vector.shape_cast %27 : vector<4x8xf32> to vector<4x8x1xf32>
    %29 = vector.broadcast %28 : vector<4x8x1xf32> to vector<4x8x8xf32>
    %30 = arith.subf %26, %29 : vector<4x8x8xf32>
    %31 = math.exp %30 : vector<4x8x8xf32>
    %cst_10 = arith.constant dense<0.000000e+00> : vector<4x8xf32>
    %32 = vector.multi_reduction <add>, %31, %cst_10 [2] : vector<4x8x8xf32> to vector<4x8xf32>
    %33 = vector.shape_cast %32 : vector<4x8xf32> to vector<4x8x1xf32>
    %34 = tpu.reciprocal %33 {approx = true} : vector<4x8x1xf32> -> vector<4x8x1xf32>
    %35 = vector.broadcast %34 : vector<4x8x1xf32> to vector<4x8x8xf32>
    %36 = arith.mulf %31, %35 : vector<4x8x8xf32>
    "tpu.trace_start"() <{level = 10 : i32, message = "hqk,hkd->hqd"}> : () -> ()
    %cst_11 = arith.constant dense<0.000000e+00> : vector<4x8x8xf32>
    %37 = tpu.matmul %36, %10, %cst_11 {dimension_numbers = #tpu.dot_dimension_numbers<[2], [1], [1], [2], [0, 0, 0, 1, 1, 2], [0], [0]>} : vector<4x8x8xf32>, vector<4x8x8xf32>, vector<4x8x8xf32> -> vector<4x8x8xf32>
    "tpu.trace_stop"() : () -> ()
    %c0_12 = arith.constant 0 : index
    %c0_13 = arith.constant 0 : index
    %c0_14 = arith.constant 0 : index
    %38 = vector.load %arg3[%c0_12, %c0_13, %c0_14] : memref<4x8x128xf32, #tpu.memory_space<vmem>>, vector<4x8x128xf32>
    "tpu.trace_start"() <{level = 10 : i32, message = "hqd,hde->hqe"}> : () -> ()
    %cst_15 = arith.constant dense<0.000000e+00> : vector<4x8x128xf32>
    %39 = tpu.matmul %37, %38, %cst_15 {dimension_numbers = #tpu.dot_dimension_numbers<[2], [1], [1], [2], [0, 0, 0, 1, 1, 2], [0], [0]>} : vector<4x8x8xf32>, vector<4x8x128xf32>, vector<4x8x128xf32> -> vector<4x8x128xf32>
    "tpu.trace_stop"() : () -> ()
    %cst_16 = arith.constant dense<0.000000e+00> : vector<8x128xf32>
    %40 = vector.multi_reduction <add>, %39, %cst_16 [0] : vector<4x8x128xf32> to vector<8x128xf32>
    %c0_17 = arith.constant 0 : index
    %c0_18 = arith.constant 0 : index
    %41 = vector.load %arg4[%c0_17, %c0_18] : memref<1x128xf32, #tpu.memory_space<vmem>>, vector<1x128xf32>
    %42 = vector.broadcast %41 : vector<1x128xf32> to vector<8x128xf32>
    %43 = arith.addf %40, %42 : vector<8x128xf32>
    %c0_19 = arith.constant 0 : index
    %c0_20 = arith.constant 0 : index
    %c0_21 = arith.constant 0 : index
    %44 = vector.load %arg5[%c0_19, %c0_20, %c0_21] : memref<1x8x128xf32, #tpu.memory_space<vmem>>, vector<1x8x128xf32>
    %45 = vector.shape_cast %44 : vector<1x8x128xf32> to vector<8x128xf32>
    %46 = vector.shape_cast %43 : vector<8x128xf32> to vector<1x8x128xf32>
    tpu.vector_store %arg5[%c0_19, %c0_20, %c0_21], %46 {strides = array<i32>} : memref<1x8x128xf32, #tpu.memory_space<vmem>>, vector<1x8x128xf32>,
    return
  }
  func.func @transform_0(%arg0: i32) -> (i32, i32, i32) {
    %c0_i32 = arith.constant 0 : i32
    %c0_i32_0 = arith.constant 0 : i32
    %c0_i32_1 = arith.constant 0 : i32
    return %arg0, %c0_i32, %c0_i32_0 : i32, i32, i32
  }
  func.func @transform_1(%arg0: i32) -> (i32, i32, i32) {
    %c0_i32 = arith.constant 0 : i32
    %c0_i32_0 = arith.constant 0 : i32
    %c0_i32_1 = arith.constant 0 : i32
    %c0_i32_2 = arith.constant 0 : i32
    return %c0_i32, %c0_i32_0, %c0_i32_1 : i32, i32, i32
  }
  func.func @transform_2(%arg0: i32) -> (i32, i32, i32) {
    %c0_i32 = arith.constant 0 : i32
    %c0_i32_0 = arith.constant 0 : i32
    %c0_i32_1 = arith.constant 0 : i32
    %c0_i32_2 = arith.constant 0 : i32
    return %c0_i32, %c0_i32_0, %c0_i32_1 : i32, i32, i32
  }
  func.func @transform_3(%arg0: i32) -> (i32, i32) {
    %c0_i32 = arith.constant 0 : i32
    %c0_i32_0 = arith.constant 0 : i32
    %c0_i32_1 = arith.constant 0 : i32
    return %c0_i32, %c0_i32_0 : i32, i32
  }
  func.func @transform_4(%arg0: i32) -> (i32, i32, i32) {
    %c0_i32 = arith.constant 0 : i32
    %c0_i32_0 = arith.constant 0 : i32
    %c0_i32_1 = arith.constant 0 : i32
    return %arg0, %c0_i32, %c0_i32_0 : i32, i32, i32
  }
}

</mosaic_0001>

<bundles_post_ra>
// kernel: tpu_custom_call.1
= control target key start
LH: loop header
LB: loop body
LE: loop exit
PB: predicated region body
PF: predicated region fallthrough
CT: control target
= control target key end

     0   :  { %9 = vsyncpa [#allocation3], 0  ;;  %s2604_s0 = inlined_call_operand.vmem [shape: f32[2,8,128], index: 0, kind: input, shape index: {}]   ;;  %s2605_s1 = inlined_call_operand.vmem [shape: f32[4,128,24], index: 1, kind: input, shape index: {}]   ;;  %s2606_s2 = inlined_call_operand.vmem [shape: f32[4,8,128], index: 2, kind: input, shape index: {}]   ;;  %s2607_s3 = inlined_call_operand.vmem [shape: f32[1,128], index: 3, kind: input, shape index: {}]   ;;  %s2608_s4 = inlined_call_operand.hbm [shape: f32[2,8,128], index: 4, kind: output, shape index: {}]  }
   0x1   :  { %11 = vsyncpa [#allocation3 + $0x1], 0  ;;  %s2168_s15 = smov 0   ;;  %s2170_s16 = smov 0  }
   0x2   :  { %s2172_s17 = smov 0   ;;  %s2174_s18 = smov 0  }
   0x3 LB: > { %s2189_s19 = sadd.s32 4294967295, %s2135_s18   ;;  %s1597_s20 = sadd.s32 4294967294, %s2135_s18   ;;  %s2135_s18 = sphi %s2174_s18, %s2614_s18   ;;  %s2131_s17 = sphi %s2172_s17, %s2613_s17   ;;  %s2127_s16 = sphi %s2170_s16, %s2612_s16   ;;  %s2123_s15 = sphi %s2168_s15, %s2611_s15  }
   0x4   : > { %s2193_s21 = sadd.s32 1, %s2135_s18   ;;  %s113_s22 = sadd.s32 1, %s2131_s17 }
   0x5   : > { %s110_s23 = ssub.s32 %s2135_s18, %s2193_s21  ;;  %p123_p0 = scmp.ne.s32.totalorder %s2131_s17, %s2127_s16 }
   0x6   : > { %p111_p1 = scmp.eq.s32.totalorder %s110_s23, 0  ;;  %p124_p2 = scmp.eq.s32.totalorder %s2189_s19, 1 }
   0x7   : > { %p129_p3 = scmp.ne.s32.totalorder %s2127_s16, %s2123_s15  ;;  %p130_p4 = scmp.eq.s32.totalorder %s1597_s20, 1 }
   0x8   : > { %s2204_s24 = scalar_select %p111_p1, %s2131_s17, %s113_s22  }
   0x9   : > { %p2206_p5 = por %p124_p2, %p123_p0  ;;  %p2210_p6 = por %p130_p4, %p129_p3 }
   0xa   : > { %p1600_p7 = scmp.ge.s32.totalorder %s2135_s18, 1  ;;  %p164_p8 = scmp.lt.s32.totalorder %s2135_s18, 3 }
   0xc   : > { %p165_p9 = pnand %p1600_p7, %p164_p8 }
   0xd   : > { %v194_v0 = vld [vmem:[%s2605_s1] sm:$0xff] (!%p165_p9)  ;;  %v195_v1 = vld [vmem:[%s2605_s1 + $0x8] sm:$0xff] (!%p165_p9)  ;;  %v2137_v3 = vmov (!%p165_p9), 0.0|0.0   ;;  %v196_v6 = vld [vmem:[%s2605_s1 + $0x10] sm:$0xff] (!%p165_p9)  ;;  %vm2138_vm0 = vmmov (!%p165_p9), 0   ;;  %v2139_v11 = vmov (!%p165_p9), 0.0  }
   0xe   : > { %168 = sbr.rel (%p165_p9) target bundleno = 1383 (0x567), region = 36  ;;  %v210_v2 = vld [vmem:[%s2605_s1 + $0x80] sm:$0xff] (!%p165_p9)  ;;  %1917 = vmatprep.subr.bf16.mxu0 (!%p165_p9), %v2137_v3  ;;  %v1918_v4 = vpack.c.bf16 (!%p165_p9), %v195_v1, %v194_v0  ;;  %1941 = vmatprep.subr.bf16.mxu1 (!%p165_p9), %v2137_v3  ;;  %v211_v5 = vld [vmem:[%s2605_s1 + $0x88] sm:$0xff] (!%p165_p9)  ;;  %v197_v7 = vld [vmem:[%s2605_s1 + $0x18] sm:$0xff] (!%p165_p9)  ;;  %p189_p10 = scmp.lt.s32.totalorder (!%p165_p9), %s2189_s19, 1  ;;  %vm558_vm1 = vcmask (!%p165_p9), 64512  }
   0xf   : > { %v1942_v8 = vpack.c.bf16 (!%p165_p9), %v211_v5, %v210_v2  ;;  %v212_v9 = vld [vmem:[%s2605_s1 + $0x90] sm:$0xff] (!%p165_p9)  ;;  %v213_v10 = vld [vmem:[%s2605_s1 + $0x98] sm:$0xff] (!%p165_p9)  ;;  %1749 = vmatprep.mubr.msk.f32.mxu0 (!%p165_p9), %vm2138_vm0, %v2139_v11  ;;  %1784 = vmatprep.mubr.msk.f32.mxu1 (!%p165_p9), %vm2138_vm0, %v2139_v11  ;;  %v1921_v12 = vpack.c.bf16 (!%p165_p9), %v197_v7, %v196_v6  ;;  %v198_v14 = vld [vmem:[%s2605_s1 + $0x20] sm:$0xff] (!%p165_p9)  ;;  %s2140_s20 = smov (!%p165_p9), 120   ;;  %s2141_s22 = smov (!%p165_p9), 112  }
  0x10   : > { %1919 = vmatpush3.bf16.msra.mxu0 (!%p165_p9), %v1918_v4  ;;  %v1945_v13 = vpack.c.bf16 (!%p165_p9), %v213_v10, %v212_v9  ;;  %v199_v15 = vld [vmem:[%s2605_s1 + $0x28] sm:$0xff] (!%p165_p9)  ;;  %v214_v16 = vld [vmem:[%s2605_s1 + $0xa0] sm:$0xff] (!%p165_p9)  ;;  %v200_v20 = vld [vmem:[%s2605_s1 + $0x30] sm:$0xff] (!%p165_p9)  ;;  %s186_s8 = sand.u32 (!%p165_p9), 1, %s2127_s16   ;;  %s1622_s12 = sshll.u32 (!%p165_p9), %s2189_s19, 7 }
  0x11   : > { %1920 = vmatprep.subr.bf16.mxu0 (!%p165_p9), %v2137_v3  ;;  %1943 = vmatpush3.bf16.msra.mxu1 (!%p165_p9), %v1942_v8  ;;  %v215_v17 = vld [vmem:[%s2605_s1 + $0xa8] sm:$0xff] (!%p165_p9)  ;;  %v1924_v18 = vpack.c.bf16 (!%p165_p9), %v199_v15, %v198_v14  ;;  %v201_v21 = vld [vmem:[%s2605_s1 + $0x38] sm:$0xff] (!%p165_p9)  ;;  %v216_v22 = vld [vmem:[%s2605_s1 + $0xb0] sm:$0xff] (!%p165_p9)  ;;  %s1601_s9 = sshll.u32 (!%p165_p9), %s186_s8, 3  ;;  %s2562_s23 = scalar_lea.hbm (!%p165_p9), %s2608_s4, %s1622_s12 }
  0x12   : > { %1944 = vmatprep.subr.bf16.mxu1 (!%p165_p9), %v2137_v3  ;;  %v1948_v19 = vpack.c.bf16 (!%p165_p9), %v215_v17, %v214_v16  ;;  %v217_v23 = vld [vmem:[%s2605_s1 + $0xb8] sm:$0xff] (!%p165_p9)  ;;  %v1927_v24 = vpack.c.bf16 (!%p165_p9), %v201_v21, %v200_v20  ;;  %v202_v26 = vld [vmem:[%s2605_s1 + $0x40] sm:$0xff] (!%p165_p9)  ;;  %v203_v27 = vld [vmem:[%s2605_s1 + $0x48] sm:$0xff] (!%p165_p9)  ;;  %s188_s13 = scalar_lea.vmem (!%p165_p9), [#allocation2], %s1601_s9 }
  0x13   : > { %v1951_v25 = vpack.c.bf16 (!%p165_p9), %v217_v23, %v216_v22  ;;  %v218_v28 = vld [vmem:[%s2605_s1 + $0xc0] sm:$0xff] (!%p165_p9)  ;;  %v219_v29 = vld [vmem:[%s2605_s1 + $0xc8] sm:$0xff] (!%p165_p9)  ;;  %v1930_v30 = vpack.c.bf16 (!%p165_p9), %v203_v27, %v202_v26  ;;  %v204_v32 = vld [vmem:[%s2605_s1 + $0x50] sm:$0xff] (!%p165_p9)  ;;  %s1538_s14 = sshll.u32 (!%p165_p9), %s188_s13, 4  ;;  %s2564_s14 = int_to_ptr.vmem [resolvable:$true] %s1538_s14 }
  0x14   : > { %1922 = vmatpush3.bf16.msra.mxu0 (!%p165_p9), %v1921_v12  ;;  %v1954_v31 = vpack.c.bf16 (!%p165_p9), %v219_v29, %v218_v28  ;;  %v205_v33 = vld [vmem:[%s2605_s1 + $0x58] sm:$0xff] (!%p165_p9)  ;;  %v220_v34 = vld [vmem:[%s2605_s1 + $0xd0] sm:$0xff] (!%p165_p9)  ;;  %v206_v38 = vld [vmem:[%s2605_s1 + $0x60] sm:$0xff] (!%p165_p9)  ;;  %s2073_s28 = scalar_lea.vmem (!%p165_p9), %s2564_s14, 128 }
  0x15   : > { %1923 = vmatprep.subr.bf16.mxu0 %v2137_v3  ;;  %1946 = vmatpush3.bf16.msra.mxu1 %v1945_v13  ;;  %v221_v35 = vld [vmem:[%s2605_s1 + $0xd8] sm:$0xff]  ;;  %v1933_v36 = vpack.c.bf16 %v205_v33, %v204_v32  ;;  %v207_v39 = vld [vmem:[%s2605_s1 + $0x68] sm:$0xff]  ;;  %v222_v40 = vld [vmem:[%s2605_s1 + $0xe0] sm:$0xff]  ;;  %s190_s6 = scalar_select %p189_p10, %s2189_s19, 1 }
  0x16   : > { %1947 = vmatprep.subr.bf16.mxu1 %v2137_v3  ;;  %v1957_v37 = vpack.c.bf16 %v221_v35, %v220_v34  ;;  %v223_v41 = vld [vmem:[%s2605_s1 + $0xe8] sm:$0xff]  ;;  %v1936_v42 = vpack.c.bf16 %v207_v39, %v206_v38  ;;  %v208_v44 = vld [vmem:[%s2605_s1 + $0x70] sm:$0xff]  ;;  %v209_v45 = vld [vmem:[%s2605_s1 + $0x78] sm:$0xff]  ;;  %p2074_p11 = scmp.ne.s32.totalorder %s2564_s14, %s2073_s28  ;;  %s2142_s19 = smov [#allocation2]  }
  0x17   : > { %v1960_v43 = vpack.c.bf16 %v223_v41, %v222_v40  ;;  %s1602_s11 = sshll.u32 %s190_s6, 3  ;;  %v224_v46 = vld [vmem:[%s2605_s1 + $0xf0] sm:$0xff]  ;;  %v225_v47 = vld [vmem:[%s2605_s1 + $0xf8] sm:$0xff]  ;;  %v1939_v48 = vpack.c.bf16 %v209_v45, %v208_v44  ;;  %v226_v50 = vld [vmem:[%s2605_s1 + $0x100] sm:$0xff]  ;;  %s2077_s29 = sshll.u32 %s2142_s19, 4  ;;  %s2078_s29 = int_to_ptr.vmem [resolvable:$false] %s2077_s29 }
  0x18   : > { %1925 = vmatpush3.bf16.msra.mxu0 %v1924_v18  ;;  %s192_s27 = scalar_lea.vmem %s2604_s0, %s1602_s11  ;;  %v1963_v49 = vpack.c.bf16 %v225_v47, %v224_v46  ;;  %v227_v51 = vld [vmem:[%s2605_s1 + $0x108] sm:$0xff]  ;;  %v242_v52 = vld [vmem:[%s2605_s1 + $0x180] sm:$0xff]  ;;  %v228_v57 = vld [vmem:[%s2605_s1 + $0x110] sm:$0xff]  ;;  %p2075_p12 = pnand %p2074_p11, %p2206_p5 }
  0x19   : > { %1926 = vmatprep.subr.bf16.mxu0 %v2137_v3  ;;  %1949 = vmatpush3.bf16.msra.mxu1 %v1948_v19  ;;  %v243_v53 = vld [vmem:[%s2605_s1 + $0x188] sm:$0xff]  ;;  %v2349_v54 = vld [vmem:[%s192_s27] sm:$0xff]  ;;  %v1966_v55 = vpack.c.bf16 %v227_v51, %v226_v50  ;;  %v229_v58 = vld [vmem:[%s2605_s1 + $0x118] sm:$0xff]  ;;  %s1525_s27 = scalar_lea.sflag [#allocation3], %s186_s8  ;;  %s2079_s30 = scalar_lea.vmem %s2078_s29, 256 }
  0x1a   : > { %1950 = vmatprep.subr.bf16.mxu1 %v2137_v3  ;;  %v1990_v56 = vpack.c.bf16 %v243_v53, %v242_v52  ;;  %v244_v59 = vld [vmem:[%s2605_s1 + $0x190] sm:$0xff]  ;;  %v245_v60 = vld [vmem:[%s2605_s1 + $0x198] sm:$0xff]  ;;  %v1969_v61 = vpack.c.bf16 %v229_v58, %v228_v57  ;;  %v230_v63 = vld [vmem:[%s2605_s1 + $0x120] sm:$0xff]  ;;  %v542_v52 = vlaneseq  ;;  %p2076_p13 = pneg %p2075_p12  ;;  %p2080_p0 = scmp.lt.s32.totalorder %s2564_s14, %s2078_s29 }
  0x1b   : > { %v1993_v62 = vpack.c.bf16 %v245_v60, %v244_v59  ;;  %v231_v0 = vld [vmem:[%s2605_s1 + $0x128] sm:$0xff]  ;;  %v246_v1 = vld [vmem:[%s2605_s1 + $0x1a0] sm:$0xff]  ;;  %v232_v6 = vld [vmem:[%s2605_s1 + $0x130] sm:$0xff]  ;;  %p2081_p1 = scmp.lt.s32.totalorder %s2079_s30, %s2073_s28 }
  0x1c   : > { %1928 = vmatpush3.bf16.msra.mxu0 %v1927_v24  ;;  %v247_v2 = vld [vmem:[%s2605_s1 + $0x1a8] sm:$0xff]  ;;  %v1972_v4 = vpack.c.bf16 %v231_v0, %v230_v63  ;;  %v233_v7 = vld [vmem:[%s2605_s1 + $0x138] sm:$0xff]  ;;  %v248_v8 = vld [vmem:[%s2605_s1 + $0x1b0] sm:$0xff]  ;;  %v543_v53 = vshrl.u32 %v542_v52, 7 }
  0x1d   : > { %1929 = vmatprep.subr.bf16.mxu0 %v2137_v3  ;;  %1952 = vmatpush3.bf16.msra.mxu1 %v1951_v25  ;;  %v1996_v5 = vpack.c.bf16 %v247_v2, %v246_v1  ;;  %v249_v9 = vld [vmem:[%s2605_s1 + $0x1b8] sm:$0xff]  ;;  %v1975_v10 = vpack.c.bf16 %v233_v7, %v232_v6  ;;  %v234_v13 = vld [vmem:[%s2605_s1 + $0x140] sm:$0xff]  ;;  %v235_v14 = vld [vmem:[%s2605_s1 + $0x148] sm:$0xff]  ;;  %p2082_p2 = por %p2081_p1, %p2080_p0 }
  0x1e   : > { %1953 = vmatprep.subr.bf16.mxu1 %v2137_v3  ;;  %v1999_v12 = vpack.c.bf16 %v249_v9, %v248_v8  ;;  %v250_v15 = vld [vmem:[%s2605_s1 + $0x1c0] sm:$0xff]  ;;  %v251_v16 = vld [vmem:[%s2605_s1 + $0x1c8] sm:$0xff]  ;;  %v1978_v17 = vpack.c.bf16 %v235_v14, %v234_v13  ;;  %v236_v19 = vld [vmem:[%s2605_s1 + $0x150] sm:$0xff]  ;;  %v1603_v0 = vadd.s32 4294967292, %v543_v53 }
  0x1f   : > { %v2002_v18 = vpack.c.bf16 %v251_v16, %v250_v15  ;;  %v237_v20 = vld [vmem:[%s2605_s1 + $0x158] sm:$0xff]  ;;  %v252_v21 = vld [vmem:[%s2605_s1 + $0x1d0] sm:$0xff]  ;;  %v238_v25 = vld [vmem:[%s2605_s1 + $0x160] sm:$0xff]  ;;  %p2083_p3 = pnand %p2082_p2, %p2076_p13 }
  0x20   : > { %1931 = vmatpush3.bf16.msra.mxu0 %v1930_v30  ;;  %v253_v22 = vld [vmem:[%s2605_s1 + $0x1d8] sm:$0xff]  ;;  %v1981_v23 = vpack.c.bf16 %v237_v20, %v236_v19  ;;  %v239_v26 = vld [vmem:[%s2605_s1 + $0x168] sm:$0xff]  ;;  %v254_v27 = vld [vmem:[%s2605_s1 + $0x1e0] sm:$0xff] }
  0x21   : > { %1932 = vmatprep.subr.bf16.mxu0 %v2137_v3  ;;  %1955 = vmatpush3.bf16.msra.mxu1 %v1954_v31  ;;  %v2005_v24 = vpack.c.bf16 %v253_v22, %v252_v21  ;;  %v255_v28 = vld [vmem:[%s2605_s1 + $0x1e8] sm:$0xff]  ;;  %v1984_v29 = vpack.c.bf16 %v239_v26, %v238_v25  ;;  %v240_v31 = vld [vmem:[%s2605_s1 + $0x170] sm:$0xff]  ;;  %v241_v32 = vld [vmem:[%s2605_s1 + $0x178] sm:$0xff] }
  0x22   : > { %1956 = vmatprep.subr.bf16.mxu1 %v2137_v3  ;;  %v2008_v30 = vpack.c.bf16 %v255_v28, %v254_v27  ;;  %v256_v33 = vld [vmem:[%s2605_s1 + $0x1f0] sm:$0xff]  ;;  %v257_v34 = vld [vmem:[%s2605_s1 + $0x1f8] sm:$0xff]  ;;  %v1987_v35 = vpack.c.bf16 %v241_v32, %v240_v31 }
  0x24   : > { %1934 = vmatpush3.bf16.msra.mxu0 %v1933_v36  ;;  %v2011_v36 = vpack.c.bf16 %v257_v34, %v256_v33 }
  0x25   : > { %1935 = vmatprep.subr.bf16.mxu0 %v2137_v3  ;;  %1958 = vmatpush3.bf16.msra.mxu1 %v1957_v37 }
  0x26   : > { %1959 = vmatprep.subr.bf16.mxu1 %v2137_v3 }
  0x28   : > { %1937 = vmatpush3.bf16.msra.mxu0 %v1936_v42 }
  0x29   : > { %1938 = vmatprep.subr.bf16.mxu0 %v2137_v3  ;;  %1961 = vmatpush3.bf16.msra.mxu1 %v1960_v43 }
  0x2a   : > { %1962 = vmatprep.subr.bf16.mxu1 %v2137_v3 }
  0x2c   : > { %1940 = vmatpush3.bf16.msra.mxu0 %v1939_v48 }
  0x2d   : > { %1964 = vmatpush3.bf16.msra.mxu1 %v1963_v49  ;;  %1965 = vmatprep.subr.bf16.mxu0 %v2137_v3 }
  0x2e   : > { %1989 = vmatprep.subr.bf16.mxu1 %v2137_v3 }
  0x2f   : > { %1750 = vmatmul.mubr.f32.vlgmr.msra.gmra.mrb[0].mxu0 %v2349_v54 }
  0x30   : > { %1967 = vmatpush3.bf16.msra.mxu0 %v1966_v55  ;;  %1785 = vmatmul.mubr.f32.vlgmr.msra.gmra.mrb[0].mxu1 %v2349_v54 }
  0x31   : > { %1968 = vmatprep.subr.bf16.mxu0 %v2137_v3  ;;  %1991 = vmatpush3.bf16.msra.mxu1 %v1990_v56 }
  0x32   : > { %1992 = vmatprep.subr.bf16.mxu1 %v2137_v3  ;;  %1819 = vmatprep.mubr.msk.f32.mxu0 %vm2138_vm0, %v2139_v11 }
  0x33   : > { %1854 = vmatprep.mubr.msk.f32.mxu1 %vm2138_vm0, %v2139_v11 }
  0x34   : > { %1970 = vmatpush3.bf16.msra.mxu0 %v1969_v61 }
  0x35   : > { %1971 = vmatprep.subr.bf16.mxu0 %v2137_v3  ;;  %1994 = vmatpush3.bf16.msra.mxu1 %v1993_v62 }
  0x36   : > { %1995 = vmatprep.subr.bf16.mxu1 %v2137_v3 }
  0x38   : > { %1973 = vmatpush3.bf16.msra.mxu0 %v1972_v4 }
  0x39   : > { %1974 = vmatprep.subr.bf16.mxu0 %v2137_v3  ;;  %1997 = vmatpush3.bf16.msra.mxu1 %v1996_v5 }
  0x3a   : > { %1998 = vmatprep.subr.bf16.mxu1 %v2137_v3 }
  0x3c   : > { %1976 = vmatpush3.bf16.msra.mxu0 %v1975_v10 }
  0x3d   : > { %1977 = vmatprep.subr.bf16.mxu0 %v2137_v3  ;;  %2000 = vmatpush3.bf16.msra.mxu1 %v1999_v12 }
  0x3e   : > { %2001 = vmatprep.subr.bf16.mxu1 %v2137_v3 }
  0x40   : > { %1979 = vmatpush3.bf16.msra.mxu0 %v1978_v17 }
  0x41   : > { %1980 = vmatprep.subr.bf16.mxu0 %v2137_v3  ;;  %2003 = vmatpush3.bf16.msra.mxu1 %v2002_v18 }
  0x42   : > { %2004 = vmatprep.subr.bf16.mxu1 %v2137_v3 }
  0x44   : > { %1982 = vmatpush3.bf16.msra.mxu0 %v1981_v23 }
  0x45   : > { %1983 = vmatprep.subr.bf16.mxu0 %v2137_v3  ;;  %2006 = vmatpush3.bf16.msra.mxu1 %v2005_v24 }
  0x46   : > { %2007 = vmatprep.subr.bf16.mxu1 %v2137_v3 }
  0x48   : > { %1985 = vmatpush3.bf16.msra.mxu0 %v1984_v29 }
  0x49   : > { %1986 = vmatprep.subr.bf16.mxu0 %v2137_v3  ;;  %2009 = vmatpush3.bf16.msra.mxu1 %v2008_v30 }
  0x4a   : > { %2010 = vmatprep.subr.bf16.mxu1 %v2137_v3 }
  0x4c   : > { %1988 = vmatpush3.bf16.msra.mxu0 %v1987_v35 }
  0x4d   : > { %2012 = vmatpush3.bf16.msra.mxu1 %v2011_v36  ;;  %1857 = vmatprep.subr.mxu0 %v2139_v11 }
  0x4e   : > { %1862 = vmatprep.subr.mxu1 %v2139_v11 }
  0x4f   : > { %1820 = vmatmul.mubr.f32.vlgmr.msra.gmra.mrb[2].mxu0 %v2349_v54 }
  0x50   : > { %1855 = vmatmul.mubr.f32.vlgmr.msra.gmra.mrb[2].mxu1 %v2349_v54  ;;  %1859 = vmatprep.mubr.msk.f32.mxu0 %vm2138_vm0, %v2139_v11  ;;  %v545_v54 = vand.u32 127, %v542_v52  ;;  %v1219_v52 = vld [vmem:[%s2606_s2 + $0x18] sm:$0xff] }
  0x51   : > { %1864 = vmatprep.mubr.msk.f32.mxu1 %vm2138_vm0, %v2139_v11 }
  0x52   : > { %vm546_vm2 = vcmp.gt.s32.totalorder %v545_v54, %v543_v53  ;;  %vm548_vm3 = vcmp.lt.s32.totalorder %v545_v54, %v1603_v0 }
  0x53   : > { %v553_v55 = vsel %vm546_vm2, -1e+30, %v2139_v11  ;;  %vm552_vm4 = vmor %vm546_vm2, %vm548_vm3 }
  0x54   : > { %v554_v1 = vsel %vm552_vm4, -1e+30, %v2139_v11 }
 0x102   : > { %v324_v37 = vpop.f32.mrb[0].mxu0 }
 0x103   : > { %556 = vrot.lane.b32.xlu0 %v324_v37, %s2140_s20  ;;  %v1751_v3 = vpop.f32.mrb[1].mxu0  ;;  %v2465_v38 = vpop.f32.mrb[0].mxu1  ;;  %v538_v45 = vmul.f32 0.35355338, %v324_v37 }
 0x104   : > { %v1786_v39 = vpop.f32.mrb[1].mxu1  ;;  %v539_v47 = vmul.f32 0.35355338, %v2465_v38 }
 0x107   : > { %635 = vrot.lane.b32.xlu0 %v2465_v38, %s2140_s20 }
 0x122   : > { %v2468_v40 = vpop.f32.mrb[2].mxu0 }
 0x123   : > { %713 = vrot.lane.b32.xlu1 %v2468_v40, %s2140_s20  ;;  %v1821_v41 = vpop.f32.mrb[3].mxu0  ;;  %v2471_v42 = vpop.f32.mrb[2].mxu1  ;;  %v540_v49 = vmul.f32 0.35355338, %v2468_v40 }
 0x124   : > { %v1856_v43 = vpop.f32.mrb[3].mxu1  ;;  %v541_v51 = vmul.f32 0.35355338, %v2471_v42 }
 0x127   : > { %791 = vrot.lane.b32.xlu1 %v2471_v42, %s2140_s20 }
 0x175   : > { %v557_v44 = vpop.permute.xlu0 %556 }
 0x176   : > { %1858 = vmatpush3.xpose.msk.msra.mxu0 %vm558_vm1, %v557_v44 }
 0x177   : > { %1867 = vmatprep.subr.mxu0 %v2139_v11 }
 0x179   : > { %v636_v46 = vpop.permute.xlu0 %635  ;;  %1860 = vmatmul.mubr.msk.f32.vlgmr.msra.gmra.mrb[4].mxu0 %vm558_vm1, %v538_v45 }
 0x17a   : > { %1863 = vmatpush3.xpose.msk.msra.mxu1 %vm558_vm1, %v636_v46  ;;  %1869 = vmatprep.mubr.msk.f32.mxu0 %vm2138_vm0, %v2139_v11 }
 0x17b   : > { %1872 = vmatprep.subr.mxu1 %v2139_v11 }
 0x17d   : > { %1865 = vmatmul.mubr.msk.f32.vlgmr.msra.gmra.mrb[4].mxu1 %vm558_vm1, %v539_v47  ;;  %v1216_v47 = vld [vmem:[%s2606_s2] sm:$0xff] }
 0x17e   : > { %1874 = vmatprep.mubr.msk.f32.mxu1 %vm2138_vm0, %v2139_v11 }
 0x195   : > { %v714_v48 = vpop.permute.xlu1 %713 }
 0x196   : > { %1868 = vmatpush3.xpose.msk.msra.mxu0 %vm558_vm1, %v714_v48  ;;  %v1217_v48 = vld [vmem:[%s2606_s2 + $0x8] sm:$0xff] }
 0x197   : > { %1877 = vmatprep.subr.mxu0 %v2139_v11 }
 0x199   : > { %v792_v50 = vpop.permute.xlu1 %791  ;;  %1870 = vmatmul.mubr.msk.f32.vlgmr.msra.gmra.mrb[6].mxu0 %vm558_vm1, %v540_v49  ;;  %v1218_v49 = vld [vmem:[%s2606_s2 + $0x10] sm:$0xff] }
 0x19a   : > { %1873 = vmatpush3.xpose.msk.msra.mxu1 %vm558_vm1, %v792_v50  ;;  %1879 = vmatprep.mubr.msk.f32.mxu0 %vm2138_vm0, %v2139_v11 }
 0x19b   : > { %1882 = vmatprep.subr.mxu1 %v2139_v11 }
 0x19d   : > { %1875 = vmatmul.mubr.msk.f32.vlgmr.msra.gmra.mrb[6].mxu1 %vm558_vm1, %v541_v51 }
 0x19e   : > { %1884 = vmatprep.mubr.msk.f32.mxu1 %vm2138_vm0, %v2139_v11 }
 0x24c   : > { %v630_v56 = vpop.f32.mrb[4].mxu0 }
 0x24d   : > { %v631_v57 = vadd.f32 %v630_v56, %v553_v55  ;;  %v1861_v58 = vpop.f32.mrb[5].mxu0 }
 0x24f   : > { %v868_v59 = vsel %vm558_vm1, %v631_v57, -inf }
 0x250   : > { %v708_v60 = vpop.f32.mrb[4].mxu1  ;;  %869 = vmax.xlane.f32.xlu0 %v868_v59 }
 0x251   : > { %v709_v61 = vadd.f32 %v708_v60, %v553_v55  ;;  %v1866_v62 = vpop.f32.mrb[5].mxu1 }
 0x253   : > { %v871_v63 = vsel %vm558_vm1, %v709_v61, -inf }
 0x254   : > { %872 = vmax.xlane.f32.xlu1 %v871_v63 }
 0x265   : > { %912 = vrot.lane.b32.xlu1 %v324_v37, %s2141_s22 }
 0x26c   : > { %v786_v2 = vpop.f32.mrb[6].mxu0 }
 0x26d   : > { %v787_v4 = vadd.f32 %v786_v2, %v554_v1  ;;  %v1871_v5 = vpop.f32.mrb[7].mxu0 }
 0x26f   : > { %v874_v6 = vsel %vm558_vm1, %v787_v4, -inf }
 0x270   : > { %v864_v7 = vpop.f32.mrb[6].mxu1  ;;  %875 = vmax.xlane.f32.xlu0 %v874_v6 }
 0x271   : > { %v865_v8 = vadd.f32 %v864_v7, %v554_v1  ;;  %v1876_v9 = vpop.f32.mrb[7].mxu1 }
 0x273   : > { %v877_v10 = vsel %vm558_vm1, %v865_v8, -inf }
 0x274   : > { %878 = vmax.xlane.f32.xlu0 %v877_v10 }
 0x2dd   : > { %v870_v12 = vpop.xlane.xlu0 %869 }
 0x2de   : > { %v880_v13 = vsub.f32 %v631_v57, %v870_v12 }
 0x2e0   : > { %v884_v14 = vmul.f32 1.442695, %v880_v13 }
 0x2e1   : > { %v873_v15 = vpop.xlane.xlu1 %872 }
 0x2e2   : > { %2057 = vpow2.f32 %v884_v14  ;;  %v881_v16 = vsub.f32 %v709_v61, %v873_v15 }
 0x2e4   : > { %v886_v17 = vmul.f32 1.442695, %v881_v16 }
 0x2e5   : > { %v913_v18 = vpop.permute.xlu1 %912 }
 0x2e6   : > { %2059 = vpow2.f32 %v886_v17  ;;  %1878 = vmatpush3.msra.mxu0 %v913_v18 }
 0x2e7   : > { %1887 = vmatprep.subr.mxu0 %v2139_v11 }
 0x2ec   : > { %v2058_v19 = vpop.eup %2057 }
 0x2ed   : > { %v892_v20 = vsel %vm558_vm1, %v2058_v19, 0.0 }
 0x2ee   : > { %893 = vadd.xlane.f32.xlu1 %v892_v20 }
 0x2f0   : > { %v2060_v21 = vpop.eup %2059 }
 0x2f1   : > { %v895_v22 = vsel %vm558_vm1, %v2060_v21, 0.0 }
 0x2f2   : > { %896 = vadd.xlane.f32.xlu0 %v895_v22 }
 0x2fd   : > { %v876_v23 = vpop.xlane.xlu0 %875 }
 0x2fe   : > { %v882_v24 = vsub.f32 %v787_v4, %v876_v23  ;;  %v1620_v4 = vld [vmem:[%s2607_s3] ss:$0 sm:$0xff] }
 0x300   : > { %v888_v25 = vmul.f32 1.442695, %v882_v24 }
 0x301   : > { %v879_v26 = vpop.xlane.xlu0 %878 }
 0x302   : > { %2061 = vpow2.f32 %v888_v25  ;;  %v883_v27 = vsub.f32 %v865_v8, %v879_v26 }
 0x304   : > { %v890_v28 = vmul.f32 1.442695, %v883_v27 }
 0x306   : > { %2063 = vpow2.f32 %v890_v28 }
 0x30c   : > { %v2062_v29 = vpop.eup %2061 }
 0x30d   : > { %v898_v30 = vsel %vm558_vm1, %v2062_v29, 0.0 }
 0x30e   : > { %899 = vadd.xlane.f32.xlu1 %v898_v30 }
 0x310   : > { %v2064_v31 = vpop.eup %2063 }
 0x311   : > { %v901_v32 = vsel %vm558_vm1, %v2064_v31, 0.0 }
 0x312   : > { %902 = vadd.xlane.f32.xlu0 %v901_v32 }
 0x31f   : > { %1064 = vrot.lane.b32.xlu1 %v2468_v40, %s2141_s22 }
 0x323   : > { %1140 = vrot.lane.b32.xlu1 %v2471_v42, %s2141_s22 }
 0x328   : > { %988 = vrot.lane.b32.xlu0 %v2465_v38, %s2141_s22 }
 0x37b   : > { %v894_v33 = vpop.xlane.xlu1 %893 }
 0x37c   : > { %2065 = vrcp.f32 %v894_v33 }
 0x37f   : > { %v897_v36 = vpop.xlane.xlu0 %896 }
 0x380   : > { %2067 = vrcp.f32 %v897_v36 }
 0x386   : > { %v2066_v34 = vpop.eup %2065 }
 0x387   : > { %v908_v35 = vmul.f32 %v2066_v34, %v2058_v19 }
 0x389   : > { %1880 = vmatmul.mubr.msk.f32.vlgmr.msra.gmra.mrb[8].mxu0 %vm558_vm1, %v908_v35 }
 0x38a   : > { %1889 = vmatprep.mubr.msk.f32.mxu0 %vm2138_vm0, %v2139_v11  ;;  %v2068_v40 = vpop.eup %2067 }
 0x38b   : > { %v909_v38 = vmul.f32 %v2068_v40, %v2060_v21 }
 0x39b   : > { %v900_v37 = vpop.xlane.xlu1 %899 }
 0x39c   : > { %2069 = vrcp.f32 %v900_v37 }
 0x39f   : > { %v1065_v3 = vpop.permute.xlu1 %1064  ;;  %v903_v39 = vpop.xlane.xlu0 %902 }
 0x3a0   : > { %2071 = vrcp.f32 %v903_v39  ;;  %1888 = vmatpush3.msra.mxu0 %v1065_v3 }
 0x3a1   : > { %1897 = vmatprep.subr.mxu0 %v2139_v11 }
 0x3a3   : > { %v989_v41 = vpop.permute.xlu0 %988  ;;  %v1141_v42 = vpop.permute.xlu1 %1140 }
 0x3a4   : > { %1883 = vmatpush3.msra.mxu1 %v989_v41 }
 0x3a5   : > { %1885 = vmatmul.mubr.msk.f32.vlgmr.msra.gmra.mrb[8].mxu1 %vm558_vm1, %v909_v38  ;;  %1892 = vmatprep.subr.mxu1 %v2139_v11 }
 0x3a6   : > { %v2070_v43 = vpop.eup %2069  ;;  %1893 = vmatpush3.msra.mxu1 %v1141_v42  ;;  %1894 = vmatprep.mubr.msk.f32.mxu1 %vm2138_vm0, %v2139_v11 }
 0x3a7   : > { %v910_v44 = vmul.f32 %v2070_v43, %v2062_v29  ;;  %1902 = vmatprep.subr.mxu1 %v2139_v11 }
 0x3a9   : > { %1890 = vmatmul.mubr.msk.f32.vlgmr.msra.gmra.mrb[10].mxu0 %vm558_vm1, %v910_v44 }
 0x3aa   : > { %v2072_v45 = vpop.eup %2071  ;;  %1899 = vmatprep.mubr.msk.f32.mxu0 %vm2138_vm0, %v2139_v11  ;;  %1898 = vmatpush3.msra.mxu0 %v1216_v47 }
 0x3ab   : > { %v911_v46 = vmul.f32 %v2072_v45, %v2064_v31  ;;  %1907 = vmatprep.subr.mxu0 %v2139_v11 }
 0x3ad   : > { %1895 = vmatmul.mubr.msk.f32.vlgmr.msra.gmra.mrb[10].mxu1 %vm558_vm1, %v911_v46 }
 0x3ae   : > { %1904 = vmatprep.mubr.msk.f32.mxu1 %vm2138_vm0, %v2139_v11  ;;  %1903 = vmatpush3.msra.mxu1 %v1217_v48 }
 0x3af   : > { %1912 = vmatprep.subr.mxu1 %v2139_v11 }
 0x45c   : > { %v984_v50 = vpop.f32.mrb[8].mxu0 }
 0x45d   : > { %v1881_v51 = vpop.f32.mrb[9].mxu0  ;;  %1900 = vmatmul.mubr.msk.f32.vlgmr.msra.gmra.mrb[12].mxu0 %vm558_vm1, %v984_v50 }
 0x45e   : > { %1908 = vmatpush3.msra.mxu0 %v1218_v49  ;;  %1909 = vmatprep.mubr.msk.f32.mxu0 %vm2138_vm0, %v2139_v11 }
 0x478   : > { %v1060_v53 = vpop.f32.mrb[8].mxu1 }
 0x479   : > { %v1886_v54 = vpop.f32.mrb[9].mxu1  ;;  %1905 = vmatmul.mubr.msk.f32.vlgmr.msra.gmra.mrb[12].mxu1 %vm558_vm1, %v1060_v53 }
 0x47a   : > { %1913 = vmatpush3.msra.mxu1 %v1219_v52  ;;  %1914 = vmatprep.mubr.msk.f32.mxu1 %vm2138_vm0, %v2139_v11 }
 0x47c   : > { %v1136_v55 = vpop.f32.mrb[10].mxu0 }
 0x47d   : > { %v1891_v56 = vpop.f32.mrb[11].mxu0  ;;  %1910 = vmatmul.mubr.msk.f32.vlgmr.msra.gmra.mrb[14].mxu0 %vm558_vm1, %v1136_v55 }
 0x480   : > { %v1212_v57 = vpop.f32.mrb[10].mxu1 }
 0x481   : > { %v1896_v58 = vpop.f32.mrb[11].mxu1  ;;  %1915 = vmatmul.mubr.msk.f32.vlgmr.msra.gmra.mrb[14].mxu1 %vm558_vm1, %v1212_v57 }
 0x530   : > { %v1289_v59 = vpop.f32.mrb[12].mxu0 }
 0x531   : > { %v1901_v60 = vpop.f32.mrb[13].mxu0 }
 0x54c   : > { %v1362_v61 = vpop.f32.mrb[12].mxu1 }
 0x54d   : > { %v1512_v62 = vadd.f32 %v1362_v61, %v1289_v59  ;;  %v1906_v63 = vpop.f32.mrb[13].mxu1 }
 0x550   : > { %v1435_v0 = vpop.f32.mrb[14].mxu0 }
 0x551   : > { %v1513_v1 = vadd.f32 %v1512_v62, %v1435_v0  ;;  %v1911_v11 = vpop.f32.mrb[15].mxu0 }
 0x554   : > { %v1508_v2 = vpop.f32.mrb[14].mxu1 }
 0x555   : > { %v1514_v5 = vadd.f32 %v1513_v1, %v1508_v2  ;;  %v1916_v6 = vpop.f32.mrb[15].mxu1 }
 0x557   : > { %v1522_v7 = vadd.f32 %v1620_v4, %v1514_v5 }
 0x559   : > { %1523 = vst [vmem:[%s188_s13] sm:$0xff] %v1522_v7 }
 0x55a   : > { %2086 = shalt.err (!%p2083_p3)
}
 0x55b   : > { %s2087_s5 = scalar_lea.hbm %s2562_s23, 128  ;;  %s2091_s8 = scalar_lea.hbm %s2608_s4, 256 }
 0x55c   : > { %p2088_p4 = scmp.ne.s32.totalorder %s2562_s23, %s2087_s5  ;;  %p2092_p9 = scmp.lt.u32.totalorder %s2562_s23, %s2608_s4 }
 0x55d   : > { %p2093_p10 = scmp.lt.u32.totalorder %s2091_s8, %s2087_s5  ;;  %p2095_p12 = scmp.lt.u32.totalorder %s2087_s5, %s2562_s23 }
 0x55e   : > { %p2089_p7 = pnand %p2088_p4, %p2206_p5 }
 0x55f   : > { %p2094_p11 = por %p2093_p10, %p2092_p9 }
 0x560   : > { %p2090_p8 = pneg %p2089_p7 }
 0x561   : > { %p2096_p13 = por %p2095_p12, %p2094_p11 }
 0x563   : > { %p2097_p0 = pnand %p2096_p13, %p2090_p8 }
 0x565   : > { %2100 = shalt.err (!%p2097_p0)
}
 0x566   : > { %2013 = dma.vmem_to_hbm [thread:$0]  (%p2206_p5), %s2564_s14, 128, %s2562_s23, %s1525_s27  }
 0x567 PF: > { %p2019_p1 = scmp.ge.s32.totalorder %s2135_s18, 2  ;;  %s1550_s11 = sand.u32 1, %s2123_s15  }
 0x568   : > { %s1551_s12 = scalar_lea.sflag [#allocation3], %s1550_s11 }
 0x569   : > { %p2016_p2 = pnand %p2019_p1, %p2210_p6 }
 0x56b   : > { %2118 = dma.done.wait (!%p2016_p2), %s1551_s12, 128  }
 0x56c   : > { %2120 = vsyncadd (!%p2016_p2), %s1551_s12, 4294967168  ;;  %p14_p3 = scmp.ge.s32.totalorder %s2193_s21, 4   ;;  %s2611_s15 = smov %s2127_s16 }
 0x56d   : > { %s2612_s16 = smov %s2131_s17  ;;  %s2613_s17 = smov %s2204_s24 }
 0x56e   : > { %s2614_s18 = smov %s2193_s21  ;;  %16 = sbr.rel (!%p14_p3) target bundleno = 3 (0x3), region = 71 }
 0x575   :  { %1556 = vsyncpa [#allocation3], 1 }
 0x576   :  { %1558 = vsyncpa [#allocation3 + $0x1], 1 }

</bundles_post_ra>
